<compile_context>
chip_gen: v7x
topology: tpu7x:2x2x1
jax: 0.10.0
libtpu: 0.0.40
codegen_flags: <defaults>
</compile_context>

<pallas_src>
import math
import functools

import jax
import jax.numpy as jnp
from jax.experimental import pallas as pl
from jax.experimental.pallas import tpu as pltpu


# ----------------------------------------------------------------------------
# Tile-size helpers
# ----------------------------------------------------------------------------
def _pick_tile(dim, target, align):
    """Largest multiple of `align` that divides `dim` and is <= target.
    Falls back to the full dim (always a legal block shape)."""
    if dim <= target:
        return dim
    t = (target // align) * align
    while t >= align:
        if dim % t == 0:
            return t
        t -= align
    return dim


def _attention_q_tile(sq, h, sk, d):
    """Pick a q-row tile that keeps per-block VMEM well under the scoped limit."""
    budget = 12 * 1024 * 1024
    # probs out (double-buffered) + in-kernel f32 temporaries + q/o blocks, per q row
    per_row = 2 * h * sk * 4 + 4 * sk * 4 + 4 * d * 4
    cap = max(8, budget // max(per_row, 1))
    return _pick_tile(sq, min(256, int(cap)), 8)


# ----------------------------------------------------------------------------
# Pallas kernels
# ----------------------------------------------------------------------------
def _linear_kernel(x_ref, w_ref, b_ref, o_ref, acc_ref, *, compute_dtype):
    # Tiled  y = x @ W + b  with W already stored as (d_in, d_out), K axis last in grid.
    @pl.when(pl.program_id(2) == 0)
    def _():
        acc_ref[...] = jnp.zeros_like(acc_ref)

    acc_ref[...] += jnp.dot(
        x_ref[...].astype(compute_dtype),  # w_ref is already in compute_dtype
        w_ref[...],
        preferred_element_type=jnp.float32,
    )

    @pl.when(pl.program_id(2) == pl.num_programs(2) - 1)
    def _():
        o_ref[...] = (acc_ref[...] + b_ref[...].astype(jnp.float32)).astype(o_ref.dtype)


def _attention_kernel(*refs, h, d_k, scale, compute_dtype, has_mask):
    # One (batch, q-row-block) tile per grid step.  Heads are packed in the lane
    # dimension (D = h * d_k) and processed with a static (unrolled) head loop.
    if has_mask:
        q_ref, k_ref, v_ref, m_ref, o_ref, p_ref = refs
    else:
        q_ref, k_ref, v_ref, o_ref, p_ref = refs
        m_ref = None

    q = q_ref[0]  # (tq, D) input dtype
    k = k_ref[0]  # (Sk, D)
    v = v_ref[0]  # (Sk, D)

    # Fold 1/sqrt(d_k) into q (O(tq*D)), cast MXU inputs once.
    q = (q * jnp.float32(scale)).astype(compute_dtype)
    k = k.astype(compute_dtype)
    v = v.astype(compute_dtype)

    if has_mask:
        masked_out = m_ref[0] == 0  # (tq, Sk) bool, shared by all heads

    contract = (((1,), (1,)), ((), ()))  # 'qd,kd->qk' without materializing k.T
    outs = []
    for head in range(h):
        sl = slice(head * d_k, (head + 1) * d_k)
        qh = q[:, sl]
        kh = k[:, sl]
        vh = v[:, sl]

        scores = jax.lax.dot_general(qh, kh, contract,
                                     preferred_element_type=jnp.float32)  # (tq, Sk)
        if has_mask:
            scores = jnp.where(masked_out, jnp.float32(-1000000000.0), scores)

        # numerically-stable softmax over the key axis
        m_max = jnp.max(scores, axis=-1, keepdims=True)
        e = jnp.exp(scores - m_max)
        denom = jnp.sum(e, axis=-1, keepdims=True)
        p = e * pl.reciprocal(denom, approx=True)  # EUP slot, off the VPU path

        p_ref[0, head] = p.astype(p_ref.dtype)  # full-lane-width (tq, Sk) store
        outs.append(jnp.dot(p.astype(compute_dtype), vh,
                            preferred_element_type=jnp.float32))  # (tq, d_k)

    # Single lane-dense (tq, H*d_k) store instead of h masked partial stores.
    o_ref[0] = jnp.concatenate(outs, axis=-1).astype(o_ref.dtype)


# ----------------------------------------------------------------------------
# pallas_call wrappers
# ----------------------------------------------------------------------------
def pallas_linear(x, w_t, b2, *, compute_dtype):
    """x: (M, K) ; w_t: (K, N) pre-transposed (and pre-cast) weight ; b2: (1, N)."""
    M, K = x.shape
    K2, N = w_t.shape
    assert K == K2
    tm = _pick_tile(M, 256, 8)
    tn = _pick_tile(N, 256, 128)
    tk = _pick_tile(K, 512, 128)

    kernel = functools.partial(_linear_kernel, compute_dtype=compute_dtype)
    grid_spec = pltpu.PrefetchScalarGridSpec(
        num_scalar_prefetch=0,
        grid=(M // tm, N // tn, K // tk),
        in_specs=[
            pl.BlockSpec((tm, tk), lambda i, j, kk: (i, kk)),
            pl.BlockSpec((tk, tn), lambda i, j, kk: (kk, j)),
            pl.BlockSpec((1, tn), lambda i, j, kk: (0, j)),
        ],
        out_specs=pl.BlockSpec((tm, tn), lambda i, j, kk: (i, j)),
        scratch_shapes=[pltpu.VMEM((tm, tn), jnp.float32)],
    )
    return pl.pallas_call(
        kernel,
        grid_spec=grid_spec,
        out_shape=jax.ShapeDtypeStruct((M, N), x.dtype),
        compiler_params=pltpu.CompilerParams(
            dimension_semantics=("parallel", "parallel", "arbitrary")),
    )(x, w_t, b2)


def pallas_attention(q, k, v, mask, h, d_k, *, compute_dtype,
                     probs_dtype=jnp.float32):
    """q,k,v: (B, S, H*Dk) lane-dense ; mask: (B, Sq, Sk) int8 or None.

    Returns (out (B, Sq, H*Dk), p_attn (B, H, Sq, Sk))."""
    B, Sq, D = q.shape
    Sk = k.shape[1]
    scale = 1.0 / math.sqrt(d_k)
    tq = _attention_q_tile(Sq, h, Sk, D)
    has_mask = mask is not None

    kernel = functools.partial(_attention_kernel, h=h, d_k=d_k, scale=scale,
                               compute_dtype=compute_dtype, has_mask=has_mask)

    in_specs = [
        pl.BlockSpec((1, tq, D), lambda b, qi: (b, qi, 0)),   # q rows
        pl.BlockSpec((1, Sk, D), lambda b, qi: (b, 0, 0)),    # K resident across qi
        pl.BlockSpec((1, Sk, D), lambda b, qi: (b, 0, 0)),    # V resident across qi
    ]
    args = [q, k, v]
    if has_mask:
        in_specs.append(pl.BlockSpec((1, tq, Sk), lambda b, qi: (b, qi, 0)))
        args.append(mask)

    grid_spec = pltpu.PrefetchScalarGridSpec(
        num_scalar_prefetch=0,
        grid=(B, Sq // tq),
        in_specs=in_specs,
        out_specs=[
            pl.BlockSpec((1, tq, D), lambda b, qi: (b, qi, 0)),        # attention out
            pl.BlockSpec((1, h, tq, Sk), lambda b, qi: (b, 0, qi, 0)),  # attention probs
        ],
    )
    out, p_attn = pl.pallas_call(
        kernel,
        grid_spec=grid_spec,
        out_shape=(
            jax.ShapeDtypeStruct((B, Sq, D), q.dtype),
            jax.ShapeDtypeStruct((B, h, Sq, Sk), probs_dtype),
        ),
        compiler_params=pltpu.CompilerParams(
            dimension_semantics=("parallel", "parallel")),
    )(*args)
    return out, p_attn


# ----------------------------------------------------------------------------
# Module wrapper
# ----------------------------------------------------------------------------
class MultiHeadedAttentionPallas:
    """JAX/Pallas re-implementation of the PyTorch MultiHeadedAttention forward."""

    def __init__(self, d_model, h, key, dropout=0.1, compute_dtype=jnp.bfloat16):
        assert d_model % h == 0
        self.d_model = d_model
        self.h = h
        self.d_k = d_model // h
        self.compute_dtype = compute_dtype
        # 5 linear layers (only 0..3 used in forward), PyTorch-style uniform init.
        bound = 1.0 / math.sqrt(d_model)
        keys = jax.random.split(key, 10)
        self.weights, self.biases = [], []   # PyTorch convention (d_out, d_in), f32
        self.w_t, self.b2 = [], []           # kernel copies: (d_in, d_out) compute dtype
        for i in range(5):
            w = jax.random.uniform(keys[2 * i], (d_model, d_model),
                                   minval=-bound, maxval=bound, dtype=jnp.float32)
            b = jax.random.uniform(keys[2 * i + 1], (d_model,),
                                   minval=-bound, maxval=bound, dtype=jnp.float32)
            self.weights.append(w)
            self.biases.append(b)
            self.w_t.append(jnp.asarray(w.T, dtype=compute_dtype))  # pre-transposed once
            self.b2.append(b.reshape(1, d_model))
        # TODO(synk): training-mode dropout (p=0.1) on p_attn not implemented.

    def _normalize_mask(self, mask, B, Sq, Sk):
        if mask is None:
            return None
        m = mask
        if m.ndim == 4:                     # caller already did unsqueeze(1)
            m = m.reshape(m.shape[0], m.shape[-2], m.shape[-1])
        if m.ndim == 2:                     # (Sq, Sk) shared mask
            m = m[None]
        m = jnp.broadcast_to(m, (B, Sq, Sk))
        return (m != 0).astype(jnp.int8)    # int8: 4x less DMA than int32

    def __call__(self, query, key, value, mask=None, with_mem=False):
        B, Sq, D = query.shape
        Sk = key.shape[1]
        H, Dk = self.h, self.d_k

        # Q/K/V projections stay in lane-dense (B, S, H*Dk) layout — no HBM transposes.
        def project(i, x):
            S = x.shape[1]
            y = pallas_linear(x.reshape(B * S, D), self.w_t[i], self.b2[i],
                              compute_dtype=self.compute_dtype)
            return y.reshape(B, S, D)

        q = project(0, query)
        k = project(1, key)
        v = project(2, value)

        mask3 = self._normalize_mask(mask, B, Sq, Sk)

        x, p_attn = pallas_attention(q, k, v, mask3, H, Dk,
                                     compute_dtype=self.compute_dtype)

        # Output projection reads the attention output directly (already (B, Sq, H*Dk)).
        out = pallas_linear(x.reshape(B * Sq, D), self.w_t[3], self.b2[3],
                            compute_dtype=self.compute_dtype)
        out = out.reshape(B, Sq, D)

        if with_mem:
            mem = v.reshape(B, Sk, H, Dk).transpose(0, 2, 1, 3)  # matches PyTorch `value`
            return out, mem, p_attn
        return out, p_attn


# ----------------------------------------------------------------------------
# Demo / smoke test
# ----------------------------------------------------------------------------
if __name__ == "__main__":
    B, S, d_model, h = 2, 8, 32, 4
    d_k = d_model // h

    root = jax.random.PRNGKey(0)
    k_params, k_q, k_k, k_v = jax.random.split(root, 4)

    query = jax.random.normal(k_q, (B, S, d_model), dtype=jnp.float32)
    key_in = jax.random.normal(k_k, (B, S, d_model), dtype=jnp.float32)
    value = jax.random.normal(k_v, (B, S, d_model), dtype=jnp.float32)

    causal = jnp.tril(jnp.ones((S, S), dtype=jnp.int32))
    mask = jnp.broadcast_to(causal[None], (B, S, S))

    def ref_forward(weights, biases, q_in, k_in, v_in, mask_in):
        def proj(i, x):
            y = x.reshape(B * S, d_model) @ weights[i].T + biases[i]
            return y.reshape(B, S, h, d_k).transpose(0, 2, 1, 3)
        q, k, v = proj(0, q_in), proj(1, k_in), proj(2, v_in)
        scores = jnp.einsum("bhqd,bhkd->bhqk", q, k) / math.sqrt(d_k)
        if mask_in is not None:
            scores = jnp.where(mask_in[:, None] == 0, -1000000000.0, scores)
        p = jax.nn.softmax(scores, axis=-1)
        x = jnp.einsum("bhqk,bhkd->bhqd", p, v)
        x = x.transpose(0, 2, 1, 3).reshape(B, S, d_model)
        o = x.reshape(B * S, d_model) @ weights[3].T + biases[3]
        return o.reshape(B, S, d_model), p

    # --- f32 compute path (tight tolerance), masked -----------------------------
    mha_f32 = MultiHeadedAttentionPallas(d_model, h, k_params,
                                         compute_dtype=jnp.float32)
    out32, attn32 = mha_f32(query, key_in, value, mask=mask)
    jax.block_until_ready(out32)
    jax.block_until_ready(attn32)
    assert out32.shape == (B, S, d_model)
    assert attn32.shape == (B, h, S, S)

    ref_out, ref_attn = ref_forward(mha_f32.weights, mha_f32.biases,
                                    query, key_in, value, mask)
    assert jnp.allclose(out32, ref_out, atol=2e-3, rtol=2e-3)
    assert jnp.allclose(attn32, ref_attn, atol=2e-3, rtol=2e-3)

    # --- bf16 MXU path (default), no mask (maskless kernel variant) -------------
    mha_bf16 = MultiHeadedAttentionPallas(d_model, h, k_params,
                                          compute_dtype=jnp.bfloat16)
    out16, attn16 = mha_bf16(query, key_in, value, mask=None)
    jax.block_until_ready(out16)
    jax.block_until_ready(attn16)

    ref_out2, ref_attn2 = ref_forward(mha_bf16.weights, mha_bf16.biases,
                                      query, key_in, value, None)
    assert jnp.allclose(out16, ref_out2, atol=5e-2, rtol=5e-2)
    assert jnp.allclose(attn16, ref_attn2, atol=5e-2, rtol=5e-2)

    print("KERNEL_OK")
</pallas_src>

<mosaic_0001>
module attributes {stable_mosaic.version = 11 : i64} {
  func.func @_linear_kernel(%arg0: i32, %arg1: i32, %arg2: i32, %arg3: memref<16x32xf32, #tpu.memory_space<vmem>>, %arg4: memref<32x32xf32, #tpu.memory_space<vmem>>, %arg5: memref<1x32xf32, #tpu.memory_space<vmem>>, %arg6: memref<16x32xf32, #tpu.memory_space<vmem>>, %arg7: memref<16x32xf32, #tpu.memory_space<vmem>>) attributes {dimension_semantics = [#tpu.dimension_semantics<parallel>, #tpu.dimension_semantics<parallel>, #tpu.dimension_semantics<arbitrary>], iteration_bounds = array<i64: 1, 1, 1>, scalar_prefetch = 0 : i64, scratch_operands = 1 : i64, tpu.core_type = #tpu.core_type<tc>, window_params = [{transform_indices = @transform_0, window_bounds = array<i64: 16, 32>}, {transform_indices = @transform_1, window_bounds = array<i64: 32, 32>}, {transform_indices = @transform_2, window_bounds = array<i64: 1, 32>}, {transform_indices = @transform_3, window_bounds = array<i64: 16, 32>}]} {
    %c0_i32 = arith.constant 0 : i32
    %0 = arith.cmpi eq, %arg2, %c0_i32 : i32
    %1 = arith.extui %0 : i1 to i32
    %c0_i32_0 = arith.constant 0 : i32
    %2 = arith.cmpi ne, %1, %c0_i32_0 : i32
    scf.if %2 {
      %cst_10 = arith.constant 0.000000e+00 : f32
      %12 = vector.broadcast %cst_10 : f32 to vector<16x32xf32>
      %c0_11 = arith.constant 0 : index
      %c0_12 = arith.constant 0 : index
      %13 = vector.load %arg7[%c0_11, %c0_12] : memref<16x32xf32, #tpu.memory_space<vmem>>, vector<16x32xf32>
      tpu.vector_store %arg7[%c0_11, %c0_12], %12 {strides = array<i32>} : memref<16x32xf32, #tpu.memory_space<vmem>>, vector<16x32xf32>,
    } else {
    }
    %c0 = arith.constant 0 : index
    %c0_1 = arith.constant 0 : index
    %3 = vector.load %arg7[%c0, %c0_1] : memref<16x32xf32, #tpu.memory_space<vmem>>, vector<16x32xf32>
    %c0_2 = arith.constant 0 : index
    %c0_3 = arith.constant 0 : index
    %4 = vector.load %arg3[%c0_2, %c0_3] : memref<16x32xf32, #tpu.memory_space<vmem>>, vector<16x32xf32>
    %c0_4 = arith.constant 0 : index
    %c0_5 = arith.constant 0 : index
    %5 = vector.load %arg4[%c0_4, %c0_5] : memref<32x32xf32, #tpu.memory_space<vmem>>, vector<32x32xf32>
    %cst = arith.constant dense<0.000000e+00> : vector<16x32xf32>
    %6 = tpu.matmul %4, %5, %cst {dimension_numbers = #tpu.dot_dimension_numbers<[1], [0], [0], [1], [0, 0, 1, 1], [], []>} : vector<16x32xf32>, vector<32x32xf32>, vector<16x32xf32> -> vector<16x32xf32>
    %7 = arith.addf %3, %6 : vector<16x32xf32>
    %c0_6 = arith.constant 0 : index
    %c0_7 = arith.constant 0 : index
    %8 = vector.load %arg7[%c0_6, %c0_7] : memref<16x32xf32, #tpu.memory_space<vmem>>, vector<16x32xf32>
    tpu.vector_store %arg7[%c0_6, %c0_7], %7 {strides = array<i32>} : memref<16x32xf32, #tpu.memory_space<vmem>>, vector<16x32xf32>,
    %c0_i32_8 = arith.constant 0 : i32
    %9 = arith.cmpi eq, %arg2, %c0_i32_8 : i32
    %10 = arith.extui %9 : i1 to i32
    %c0_i32_9 = arith.constant 0 : i32
    %11 = arith.cmpi ne, %10, %c0_i32_9 : i32
    scf.if %11 {
      %c0_10 = arith.constant 0 : index
      %c0_11 = arith.constant 0 : index
      %12 = vector.load %arg7[%c0_10, %c0_11] : memref<16x32xf32, #tpu.memory_space<vmem>>, vector<16x32xf32>
      %c0_12 = arith.constant 0 : index
      %c0_13 = arith.constant 0 : index
      %13 = vector.load %arg5[%c0_12, %c0_13] : memref<1x32xf32, #tpu.memory_space<vmem>>, vector<1x32xf32>
      %14 = vector.broadcast %13 : vector<1x32xf32> to vector<16x32xf32>
      %15 = arith.addf %12, %14 : vector<16x32xf32>
      %c0_14 = arith.constant 0 : index
      %c0_15 = arith.constant 0 : index
      %16 = vector.load %arg6[%c0_14, %c0_15] : memref<16x32xf32, #tpu.memory_space<vmem>>, vector<16x32xf32>
      tpu.vector_store %arg6[%c0_14, %c0_15], %15 {strides = array<i32>} : memref<16x32xf32, #tpu.memory_space<vmem>>, vector<16x32xf32>,
    } else {
    }
    return
  }
  func.func @transform_0(%arg0: i32, %arg1: i32, %arg2: i32) -> (i32, i32) {
    %c0_i32 = arith.constant 0 : i32
    return %arg0, %arg2 : i32, i32
  }
  func.func @transform_1(%arg0: i32, %arg1: i32, %arg2: i32) -> (i32, i32) {
    %c0_i32 = arith.constant 0 : i32
    return %arg2, %arg1 : i32, i32
  }
  func.func @transform_2(%arg0: i32, %arg1: i32, %arg2: i32) -> (i32, i32) {
    %c0_i32 = arith.constant 0 : i32
    %c0_i32_0 = arith.constant 0 : i32
    return %c0_i32, %arg1 : i32, i32
  }
  func.func @transform_3(%arg0: i32, %arg1: i32, %arg2: i32) -> (i32, i32) {
    %c0_i32 = arith.constant 0 : i32
    return %arg0, %arg1 : i32, i32
  }
}

</mosaic_0001>

<bundles_post_ra>
// kernel: tpu_custom_call.1
= control target key start
LH: loop header
LB: loop body
LE: loop exit
PB: predicated region body
PF: predicated region fallthrough
CT: control target
= control target key end

     0   :  { %8 = vsyncpa [#allocation4], 0  ;;  %s366_s0 = inlined_call_operand.hbm [shape: f32[16,32], index: 0, kind: input, shape index: {}]   ;;  %s367_s1 = inlined_call_operand.hbm [shape: f32[32,32], index: 1, kind: input, shape index: {}]   ;;  %s368_s2 = inlined_call_operand.vmem [shape: f32[1,32], index: 2, kind: input, shape index: {}]   ;;  %s369_s3 = inlined_call_operand.hbm [shape: f32[16,32], index: 3, kind: output, shape index: {}]  }
   0x1   :  { %9 = vsyncpa [#allocation7], 0 }
   0x2   :  { %10 = vsyncpa [#allocation5], 0  ;;  %s284_s12 = smov [#allocation3]   ;;  %s212_s16 = scalar_lea.hbm %s366_s0, 256 }
   0x3   :  { %s16_s13 = sshll.u32 %s284_s12, 4  ;;  %p213_p0 = scmp.ne.s32.totalorder %s366_s0, %s212_s16  ;;  %s17_s13 = int_to_ptr.vmem [resolvable:$true] %s16_s13 }
   0x4   :  { %p216_p1 = scmp.lt.u32.totalorder %s212_s16, %s366_s0 }
   0x6   :  { %p218_p2 = pnand %p216_p1, %p213_p0 }
   0x8   :  { %221 = shalt.err (!%p218_p2)
}
   0x9   :  { %s222_s21 = scalar_lea.vmem %s17_s13, 256  ;;  %p227_p4 = scmp.lt.s32.totalorder %s17_s13, %s17_s13 }
   0xa   :  { %p223_p3 = scmp.ne.s32.totalorder %s17_s13, %s222_s21  ;;  %p228_p5 = scmp.lt.s32.totalorder %s222_s21, %s222_s21 }
   0xc   :  { %p229_p6 = por %p228_p5, %p227_p4 }
   0xe   :  { %p230_p7 = pnand %p229_p6, %p223_p3 }
  0x10   :  { %233 = shalt.err (!%p230_p7)
}
  0x11   :  { %s285_s22 = smov 128   ;;  %s286_s23 = smov 8  }
  0x12   :  { %22 = dma.hbm_to_vmem [thread:$0]  %s366_s0, 256, %s17_s13, [#allocation4], %s285_s22, %s285_s22, %s286_s23  }
  0x13   :  { %s287_s26 = smov [#allocation6]   ;;  %s234_s30 = scalar_lea.hbm %s367_s1, 512 }
  0x14   :  { %s28_s27 = sshll.u32 %s287_s26, 4  ;;  %p235_p8 = scmp.ne.s32.totalorder %s367_s1, %s234_s30  ;;  %s29_s27 = int_to_ptr.vmem [resolvable:$true] %s28_s27 }
  0x15   :  { %p238_p9 = scmp.lt.u32.totalorder %s234_s30, %s367_s1 }
  0x17   :  { %p240_p10 = pnand %p238_p9, %p235_p8 }
  0x19   :  { %243 = shalt.err (!%p240_p10)
}
  0x1a   :  { %s244_s8 = scalar_lea.vmem %s29_s27, 512  ;;  %p249_p12 = scmp.lt.s32.totalorder %s29_s27, %s29_s27 }
  0x1b   :  { %p245_p11 = scmp.ne.s32.totalorder %s29_s27, %s244_s8  ;;  %p250_p13 = scmp.lt.s32.totalorder %s244_s8, %s244_s8 }
  0x1d   :  { %p251_p0 = por %p250_p13, %p249_p12 }
  0x1f   :  { %p252_p1 = pnand %p251_p0, %p245_p11 }
  0x21   :  { %255 = shalt.err (!%p252_p1)
}
  0x22   :  { %34 = dma.hbm_to_vmem [thread:$0]  %s367_s1, 512, %s29_s27, [#allocation7], %s285_s22, %s285_s22, %s286_s23  }
  0x23   :  { %278 = dma.done.wait [#allocation4], 256  }
  0x24   :  { %279 = vsyncadd [#allocation4], 4294967040 }
  0x25   :  { %280 = dma.done.wait [#allocation7], 512  }
  0x26   :  { %281 = vsyncadd [#allocation7], 4294966784  ;;  %vm47_vm0 = vcmask 261120   ;;  %v288_v0 = vmov 0.0   ;;  %v54_v1 = vld [vmem:[#allocation6] sm:$0xff]  ;;  %v55_v2 = vld [vmem:[#allocation6 + $0x8] sm:$0xff] }
  0x27   :  { %49 = vst.msk [vmem:[#allocation2 + $0x8] sm:$0xff] %vm47_vm0, %v288_v0  ;;  %48 = vst.msk [vmem:[#allocation2] sm:$0xff] %vm47_vm0, %v288_v0  ;;  %v56_v3 = vld [vmem:[#allocation6 + $0x10] sm:$0xff]  ;;  %v198_v4 = vpack.c.bf16 %v55_v2, %v54_v1  ;;  %v57_v5 = vld [vmem:[#allocation6 + $0x18] sm:$0xff]  ;;  %s289_s11 = smov [#allocation8]  }
  0x28   :  { %v52_v6 = vld [vmem:[#allocation3] sm:$0xff]  ;;  %v202_v7 = vpack.c.bf16 %v57_v5, %v56_v3  ;;  %v53_v8 = vld [vmem:[#allocation3 + $0x8] sm:$0xff]  ;;  %v180_v15 = vld [vmem:[%s368_s2] ss:$0 sm:$0xff]  ;;  %s165_s12 = sshll.u32 %s289_s11, 4  ;;  %s166_s12 = int_to_ptr.vmem [resolvable:$true] %s165_s12 }
  0x29   :  { %195 = vmatprep.mubr.msk.f32.mxu0 %vm47_vm0, %v52_v6  ;;  %199 = vmatprep.subr.bf16.mxu0 %v198_v4  ;;  %s256_s13 = scalar_lea.vmem %s166_s12, 256  ;;  %p261_p3 = scmp.lt.s32.totalorder %s166_s12, %s166_s12 }
  0x2a   :  { %201 = vmatpush3.bf16.msra.mxu0 %v198_v4  ;;  %p257_p2 = scmp.ne.s32.totalorder %s166_s12, %s256_s13  ;;  %p262_p4 = scmp.lt.s32.totalorder %s256_s13, %s256_s13 }
  0x2b   :  { %203 = vmatprep.subr.bf16.mxu0 %v202_v7 }
  0x2c   :  { %p263_p5 = por %p262_p4, %p261_p3 }
  0x2e   :  { %205 = vmatpush3.bf16.msra.mxu0 %v202_v7  ;;  %v51_v9 = vld [vmem:[#allocation2 + $0x8] sm:$0xff]  ;;  %v50_v10 = vld [vmem:[#allocation2] sm:$0xff]  ;;  %p264_p6 = pnand %p263_p5, %p257_p2 }
  0x31   :  { %196 = vmatmul.mubr.msk.f32.vlgmr.msra.gmra.mrb[0].mxu0 %vm47_vm0, %v53_v8 }
 0x104   :  { %v197_v11 = vpop.f32.mrb[0].mxu0 }
 0x105   :  { %v141_v12 = vadd.f32 %v197_v11, %v51_v9  ;;  %v131_v13 = vpop.f32.mrb[1].mxu0 }
 0x106   :  { %v140_v14 = vadd.f32 %v131_v13, %v50_v10 }
 0x107   :  { %143 = vst.msk [vmem:[#allocation2 + $0x8] sm:$0xff] %vm47_vm0, %v141_v12 }
 0x108   :  { %142 = vst.msk [vmem:[#allocation2] sm:$0xff] %vm47_vm0, %v140_v14 }
 0x10e   :  { %v148_v16 = vld [vmem:[#allocation2 + $0x8] sm:$0xff] }
 0x10f   :  { %v147_v17 = vld [vmem:[#allocation2] sm:$0xff]  ;;  %v157_v18 = vadd.f32 %v180_v15, %v148_v16 }
 0x110   :  { %v156_v19 = vadd.f32 %v180_v15, %v147_v17 }
 0x111   :  { %159 = vst.msk [vmem:[#allocation8 + $0x8] sm:$0xff] %vm47_vm0, %v157_v18 }
 0x112   :  { %158 = vst.msk [vmem:[#allocation8] sm:$0xff] %vm47_vm0, %v156_v19 }
 0x113   :  { %267 = shalt.err (!%p264_p6)
}
 0x114   :  { %s268_s15 = scalar_lea.hbm %s369_s3, 256 }
 0x115   :  { %p269_p7 = scmp.ne.s32.totalorder %s369_s3, %s268_s15  ;;  %p272_p8 = scmp.lt.u32.totalorder %s268_s15, %s369_s3 }
 0x117   :  { %p274_p9 = pnand %p272_p8, %p269_p7 }
 0x119   :  { %277 = shalt.err (!%p274_p9)
}
 0x11a   :  { %171 = dma.vmem_to_hbm [thread:$0]  %s166_s12, 256, %s369_s3, [#allocation5], %s285_s22, %s285_s22, %s286_s23  }
 0x11b   :  { %282 = dma.done.wait [#allocation5], 256  }
 0x11c   :  { %283 = vsyncadd [#allocation5], 4294967040 }
 0x11d   :  { %175 = vsyncpa [#allocation4], 1 }
 0x11e   :  { %176 = vsyncpa [#allocation7], 1 }
 0x11f   :  { %177 = vsyncpa [#allocation5], 1 }

</bundles_post_ra>
